<compile_context>
chip_gen: v5e
topology: v5e:2x2
jax: 0.10.0
libtpu: 0.0.40
codegen_flags: <defaults>
</compile_context>

<pallas_src>
import functools

import jax
import jax.numpy as jnp
from jax.experimental import pallas as pl
from jax.experimental.pallas import tpu as pltpu


# --------------------------------------------------------------------------
# Hardware-aware helpers
# --------------------------------------------------------------------------
def _round_up(x, m):
    return ((x + m - 1) // m) * m


def _device_kind():
    try:
        return jax.devices()[0].device_kind.lower()
    except Exception:
        return ""


def _vmem_capacity_bytes():
    try:
        return int(pltpu.get_tpu_info().vmem_capacity_bytes)
    except Exception:
        # Fallback by generation: v7x has 64 MiB per TensorCore, v5e/v6e 128 MiB.
        return (64 << 20) if "v7" in _device_kind() else (128 << 20)


def _vmem_budget_cap():
    # Leave ~15% headroom for compiler-internal scratch.
    return int(0.85 * _vmem_capacity_bytes())


def _default_block_m():
    kind = _device_kind()
    if "v5 lite" in kind or "v5e" in kind or "v5lite" in kind:
        return 256       # v5e roofline knee ~240 FLOP/byte -> 256 is at balance
    if "v7" in kind:
        return 512       # per-TC target; megacore split handled in the wrapper
    return 1024          # v6e (and default): needs ~680 FLOP/byte on the weight stream


# --------------------------------------------------------------------------
# One-time parameter preparation (hoisted out of the per-call forward path)
# --------------------------------------------------------------------------
def prepare_encoder_params(w1, b1, w2, b2, *, block_h=512,
                           compute_dtype=jnp.bfloat16):
    """Cast + pad the Encoder weights once.

    w1: (in_dim, hidden)    b1: (hidden,) or (1, hidden)
    w2: (hidden, out_dim)   b2: (out_dim,) or (1, out_dim)
    """
    in_dim, hidden = w1.shape
    out_dim = w2.shape[1]
    assert w2.shape[0] == hidden

    # Hidden tile: multiple of 128 (lane dim of the W1 chunk / sublane dim of
    # the in-kernel W2 slice).
    block_h = min(_round_up(block_h, 128), _round_up(hidden, 128))

    # Guard the untiled in_dim dimension (important on v7x's 64 MiB VMEM):
    # shrink block_h so double-buffered W1 chunks + the resident W2 stay under
    # half the budget, leaving room for x tiles and the output accumulator.
    itm = jnp.dtype(compute_dtype).itemsize
    half_cap = _vmem_budget_cap() // 2
    while block_h > 128 and (
        2 * in_dim * block_h * itm
        + 2 * _round_up(hidden, block_h) * _round_up(out_dim, 128) * itm
    ) > half_cap:
        block_h //= 2
    block_h = max(block_h, 128)
    # TODO(synk): for extreme in_dim (>~16K on v7x) add an in_dim reduction grid
    # axis instead of only shrinking block_h.

    h_pad = _round_up(hidden, block_h)
    n_pad = _round_up(out_dim, 128)         # lane-dense output stores
    grid_k = h_pad // block_h

    b1 = jnp.reshape(b1, (1, hidden)).astype(jnp.float32)
    b2 = jnp.reshape(b2, (1, out_dim)).astype(jnp.float32)

    w1p = jnp.pad(w1.astype(compute_dtype), ((0, 0), (0, h_pad - hidden)))
    w2p = jnp.pad(w2.astype(compute_dtype),
                  ((0, h_pad - hidden), (0, n_pad - out_dim)))
    b1_row = jnp.pad(b1, ((0, 0), (0, h_pad - hidden)))
    b1_tiles = jnp.reshape(b1_row, (grid_k, block_h))
    b2p = jnp.pad(b2, ((0, 0), (0, n_pad - out_dim)))

    return dict(
        w1=w1p, b1_row=b1_row, b1_tiles=b1_tiles, w2=w2p, b2=b2p,
        in_dim=in_dim, hidden=hidden, out_dim=out_dim,
        h_pad=h_pad, n_pad=n_pad, block_h=block_h, grid_k=grid_k,
        compute_dtype=compute_dtype,
    )


# --------------------------------------------------------------------------
# Kernels
# --------------------------------------------------------------------------
def _encoder_small_kernel(x_ref, w1_ref, b1_ref, w2_ref, b2_ref, o_ref):
    """Everything resident in VMEM, grid=() — for shapes that fit."""
    h = jnp.dot(x_ref[...], w1_ref[...], preferred_element_type=jnp.float32)
    h = jnp.maximum(h + b1_ref[...], 0.0)
    o_ref[...] = (jnp.dot(h.astype(w2_ref.dtype), w2_ref[...],
                          preferred_element_type=jnp.float32) + b2_ref[...])


def _encoder_tiled_kernel(x_ref, w1_ref, b1_ref, w2_ref, b2_ref, o_ref, *,
                          block_h):
    """One (batch-tile i, hidden-tile k) step of Linear -> ReLU -> Linear.

    x_ref  : (block_m, in_dim)  bf16  batch tile (constant over k)
    w1_ref : (in_dim, block_h)  bf16  streamed hidden chunk of W1
    b1_ref : (grid_k, block_h)  f32   fully resident; row k used
    w2_ref : (h_pad,  n_pad)    bf16  fully resident; fetched once
    b2_ref : (1, n_pad)         f32   fully resident
    o_ref  : (block_m, n_pad)   f32   resident over k; accumulated in place
    """
    k = pl.program_id(1)

    # First matmul on the MXU (bf16 operands, f32 accumulation); bias-add and
    # ReLU on the VPU in f32 (v5e-safe elementwise path).
    h = jnp.dot(x_ref[...], w1_ref[...], preferred_element_type=jnp.float32)
    h = jnp.maximum(h + b1_ref[pl.ds(k, 1), :], 0.0)

    # Second matmul: this hidden chunk's contribution, sliced from resident W2.
    off = pl.multiple_of(k * block_h, block_h)
    contrib = jnp.dot(h.astype(w2_ref.dtype), w2_ref[pl.ds(off, block_h), :],
                      preferred_element_type=jnp.float32)

    @pl.when(k == 0)
    def _():
        o_ref[...] = b2_ref[...] + contrib

    @pl.when(k > 0)
    def _():
        o_ref[...] += contrib


# --------------------------------------------------------------------------
# Forward wrapper
# --------------------------------------------------------------------------
def encoder_forward(x, params, *, block_m=None, force_tiled=False):
    """x: (B, in_dim) f32 -> (B, 2*latent_dim) f32 (Linear -> ReLU -> Linear)."""
    B, in_dim = x.shape
    assert in_dim == params["in_dim"]
    cdt = params["compute_dtype"]
    itm = jnp.dtype(cdt).itemsize
    h_pad, n_pad = params["h_pad"], params["n_pad"]
    block_h, grid_k = params["block_h"], params["grid_k"]
    out_dim = params["out_dim"]

    budget_cap = _vmem_budget_cap()

    # ---- small-shape fast path: everything resident, no grid machinery -----
    small_bytes = (B * in_dim * itm + in_dim * h_pad * itm + h_pad * 4
                   + h_pad * n_pad * itm + n_pad * 4 + B * n_pad * 4)
    if (not force_tiled) and small_bytes <= min(budget_cap // 3, 24 << 20):
        out = pl.pallas_call(
            _encoder_small_kernel,
            out_shape=jax.ShapeDtypeStruct((B, n_pad), jnp.float32),
        )(x.astype(cdt), params["w1"], params["b1_row"],
          params["w2"], params["b2"])
        return out[:, :out_dim]

    # ---- tiled path ---------------------------------------------------------
    if block_m is None:
        block_m = _default_block_m()
    block_m = max(8, _round_up(block_m, 8))
    block_m = min(block_m, _round_up(B, 8))

    # v7x: make sure the "parallel" batch axis has >= 2 tiles so both
    # TensorCores get work (megacore utilization beats tile size here).
    if "v7" in _device_kind():
        while block_m > 256 and _round_up(B, block_m) // block_m < 2:
            block_m = max(256, _round_up(block_m // 2, 8))

    def tiled_vmem_bytes(bm):
        return (2 * (bm * in_dim * itm)          # x tile (double-buffered)
                + 2 * (in_dim * block_h * itm)   # W1 chunk (double-buffered)
                + 2 * (h_pad * n_pad * itm)      # resident W2 (conservative 2x)
                + 2 * (grid_k * block_h * 4)     # resident b1
                + 2 * (n_pad * 4)                # resident b2
                + 2 * (bm * n_pad * 4)           # output tile
                + (2 << 20))                     # slack

    while block_m > 8 and tiled_vmem_bytes(block_m) > budget_cap:
        block_m = max(8, _round_up(block_m // 2, 8))

    b_pad = _round_up(B, block_m)
    grid_i = b_pad // block_m
    grid = (grid_i, grid_k)

    xp = jnp.pad(x.astype(cdt), ((0, b_pad - B), (0, 0)))

    vmem_limit = int(min(max(tiled_vmem_bytes(block_m), 16 << 20), budget_cap))

    flops = 2 * b_pad * in_dim * h_pad + 2 * b_pad * h_pad * n_pad
    # W1 is re-streamed once per batch tile; W2 / b1 / b2 are fetched once.
    bytes_accessed = (b_pad * in_dim * itm
                      + grid_i * in_dim * h_pad * itm
                      + h_pad * n_pad * itm
                      + grid_k * block_h * 4 + n_pad * 4
                      + b_pad * n_pad * 4)

    kernel = functools.partial(_encoder_tiled_kernel, block_h=block_h)

    # Note: if profiling shows the W1 DMA stream exposed (very large in_dim),
    # add pipeline_mode=pl.Buffered(3) on the W1 BlockSpec below.
    out = pl.pallas_call(
        kernel,
        out_shape=jax.ShapeDtypeStruct((b_pad, n_pad), jnp.float32),
        grid_spec=pltpu.PrefetchScalarGridSpec(
            num_scalar_prefetch=0,
            grid=grid,
            in_specs=[
                pl.BlockSpec((block_m, in_dim), lambda i, k: (i, 0)),   # x tile
                pl.BlockSpec((in_dim, block_h), lambda i, k: (0, k)),   # W1 chunk
                pl.BlockSpec((grid_k, block_h), lambda i, k: (0, 0)),   # b1 (resident)
                pl.BlockSpec((h_pad, n_pad), lambda i, k: (0, 0)),      # W2 (resident)
                pl.BlockSpec((1, n_pad), lambda i, k: (0, 0)),          # b2 (resident)
            ],
            out_specs=pl.BlockSpec((block_m, n_pad), lambda i, k: (i, 0)),
        ),
        compiler_params=pltpu.CompilerParams(
            dimension_semantics=("parallel", "arbitrary"),
            vmem_limit_bytes=vmem_limit,
        ),
        cost_estimate=pl.CostEstimate(
            flops=int(flops), transcendentals=0,
            bytes_accessed=int(bytes_accessed)),
    )(xp, params["w1"], params["b1_tiles"], params["w2"], params["b2"])

    return out[:B, :out_dim]


# --------------------------------------------------------------------------
# Initialization + references
# --------------------------------------------------------------------------
def init_encoder_params(key, in_dim, latent_dim, dtype=jnp.float32):
    """nn.Linear-style init (U[-1/sqrt(fan_in), +1/sqrt(fan_in)]); W stored (in, out)."""
    hidden = in_dim * 4
    out_dim = latent_dim * 2
    k1, k2, k3, k4 = jax.random.split(key, 4)
    lim1 = 1.0 / jnp.sqrt(in_dim)
    lim2 = 1.0 / jnp.sqrt(hidden)
    w1 = jax.random.uniform(k1, (in_dim, hidden), dtype, -lim1, lim1)
    b1 = jax.random.uniform(k2, (1, hidden), dtype, -lim1, lim1)
    w2 = jax.random.uniform(k3, (hidden, out_dim), dtype, -lim2, lim2)
    b2 = jax.random.uniform(k4, (1, out_dim), dtype, -lim2, lim2)
    return w1, b1, w2, b2


def _ref_bf16(x, w1, b1, w2, b2):
    """Same bf16-operand / f32-accumulation recipe as the kernel (tight check)."""
    xb, w1b, w2b = (x.astype(jnp.bfloat16), w1.astype(jnp.bfloat16),
                    w2.astype(jnp.bfloat16))
    h = jnp.maximum(jnp.dot(xb, w1b, preferred_element_type=jnp.float32)
                    + b1.reshape(1, -1), 0.0)
    return (jnp.dot(h.astype(jnp.bfloat16), w2b,
                    preferred_element_type=jnp.float32) + b2.reshape(1, -1))


def _ref_f32(x, w1, b1, w2, b2):
    return jnp.maximum(x @ w1 + b1.reshape(1, -1), 0.0) @ w2 + b2.reshape(1, -1)


# --------------------------------------------------------------------------
if __name__ == "__main__":
    key = jax.random.PRNGKey(0)
    kx, kp, kx2, kp2 = jax.random.split(key, 4)

    # ---- Case 1: toy shape implied by the module (small-shape fast path) ----
    batch, in_dim, latent_dim = 8, 32, 16          # hidden=128, out_dim=32
    x = jax.random.normal(kx, (batch, in_dim), jnp.float32)
    w1, b1, w2, b2 = init_encoder_params(kp, in_dim, latent_dim)
    params = prepare_encoder_params(w1, b1, w2, b2)

    out = jax.block_until_ready(encoder_forward(x, params))
    assert out.shape == (batch, 2 * latent_dim)
    assert jnp.allclose(out, _ref_bf16(x, w1, b1, w2, b2), atol=1e-4, rtol=1e-4)
    assert jnp.allclose(out, _ref_f32(x, w1, b1, w2, b2), atol=1e-1, rtol=1e-1)

    # ---- Case 2: moderate shape exercising the tiled (grid) path ------------
    batch2, in_dim2, latent_dim2 = 600, 256, 64    # hidden=1024, out_dim=128
    x2 = jax.random.normal(kx2, (batch2, in_dim2), jnp.float32)
    w1b_, b1b_, w2b_, b2b_ = init_encoder_params(kp2, in_dim2, latent_dim2)
    params2 = prepare_encoder_params(w1b_, b1b_, w2b_, b2b_)

    out2 = jax.block_until_ready(
        encoder_forward(x2, params2, block_m=256, force_tiled=True))
    assert out2.shape == (batch2, 2 * latent_dim2)
    assert jnp.allclose(out2, _ref_bf16(x2, w1b_, b1b_, w2b_, b2b_),
                        atol=1e-3, rtol=1e-3)
    assert jnp.allclose(out2, _ref_f32(x2, w1b_, b1b_, w2b_, b2b_),
                        atol=1e-1, rtol=1e-1)

    print("KERNEL_OK")
</pallas_src>

<mosaic_0001>
module attributes {stable_mosaic.version = 11 : i64} {
  func.func @_encoder_small_kernel(%arg0: memref<8x32xbf16, #tpu.memory_space<vmem>>, %arg1: memref<32x128xbf16, #tpu.memory_space<vmem>>, %arg2: memref<1x128xf32, #tpu.memory_space<vmem>>, %arg3: memref<128x128xbf16, #tpu.memory_space<vmem>>, %arg4: memref<1x128xf32, #tpu.memory_space<vmem>>, %arg5: memref<8x128xf32, #tpu.memory_space<vmem>>) attributes {dimension_semantics = [], scalar_prefetch = 0 : i64, scratch_operands = 0 : i64, tpu.core_type = #tpu.core_type<tc>} {
    %c0 = arith.constant 0 : index
    %c0_0 = arith.constant 0 : index
    %0 = vector.load %arg0[%c0, %c0_0] : memref<8x32xbf16, #tpu.memory_space<vmem>>, vector<8x32xbf16>
    %c0_1 = arith.constant 0 : index
    %c0_2 = arith.constant 0 : index
    %1 = vector.load %arg1[%c0_1, %c0_2] : memref<32x128xbf16, #tpu.memory_space<vmem>>, vector<32x128xbf16>
    %cst = arith.constant dense<0.000000e+00> : vector<8x128xf32>
    %2 = tpu.matmul %0, %1, %cst {dimension_numbers = #tpu.dot_dimension_numbers<[1], [0], [0], [1], [0, 0, 1, 1], [], []>} : vector<8x32xbf16>, vector<32x128xbf16>, vector<8x128xf32> -> vector<8x128xf32>
    %c0_3 = arith.constant 0 : index
    %c0_4 = arith.constant 0 : index
    %3 = vector.load %arg2[%c0_3, %c0_4] : memref<1x128xf32, #tpu.memory_space<vmem>>, vector<1x128xf32>
    %4 = vector.broadcast %3 : vector<1x128xf32> to vector<8x128xf32>
    %5 = arith.addf %2, %4 : vector<8x128xf32>
    %cst_5 = arith.constant 0.000000e+00 : f32
    %6 = vector.broadcast %cst_5 : f32 to vector<8x128xf32>
    %7 = arith.maximumf %5, %6 : vector<8x128xf32>
    %8 = arith.truncf %7 : vector<8x128xf32> to vector<8x128xbf16>
    %c0_6 = arith.constant 0 : index
    %c0_7 = arith.constant 0 : index
    %9 = vector.load %arg3[%c0_6, %c0_7] : memref<128x128xbf16, #tpu.memory_space<vmem>>, vector<128x128xbf16>
    %cst_8 = arith.constant dense<0.000000e+00> : vector<8x128xf32>
    %10 = tpu.matmul %8, %9, %cst_8 {dimension_numbers = #tpu.dot_dimension_numbers<[1], [0], [0], [1], [0, 0, 1, 1], [], []>} : vector<8x128xbf16>, vector<128x128xbf16>, vector<8x128xf32> -> vector<8x128xf32>
    %c0_9 = arith.constant 0 : index
    %c0_10 = arith.constant 0 : index
    %11 = vector.load %arg4[%c0_9, %c0_10] : memref<1x128xf32, #tpu.memory_space<vmem>>, vector<1x128xf32>
    %12 = vector.broadcast %11 : vector<1x128xf32> to vector<8x128xf32>
    %13 = arith.addf %10, %12 : vector<8x128xf32>
    %c0_11 = arith.constant 0 : index
    %c0_12 = arith.constant 0 : index
    %14 = vector.load %arg5[%c0_11, %c0_12] : memref<8x128xf32, #tpu.memory_space<vmem>>, vector<8x128xf32>
    tpu.vector_store %arg5[%c0_11, %c0_12], %13 {strides = array<i32>} : memref<8x128xf32, #tpu.memory_space<vmem>>, vector<8x128xf32>,
    return
  }
}

</mosaic_0001>

<bundles_post_ra>
// kernel: tpu_custom_call.1
= control target key start
LH: loop header
LB: loop body
LE: loop exit
PB: predicated region body
PF: predicated region fallthrough
CT: control target
= control target key end

     0   :  { %10 = vsyncpa [#allocation3], 0  ;;  %s422_s0 = inlined_call_operand.hbm [shape: bf16[8,32], index: 0, kind: input, shape index: {}]   ;;  %s423_s1 = inlined_call_operand.hbm [shape: bf16[32,128], index: 1, kind: input, shape index: {}]   ;;  %s424_s2 = inlined_call_operand.vmem [shape: f32[1,128], index: 2, kind: input, shape index: {}]   ;;  %s425_s3 = inlined_call_operand.hbm [shape: bf16[128,128], index: 3, kind: input, shape index: {}]   ;;  %s426_s4 = inlined_call_operand.vmem [shape: f32[1,128], index: 4, kind: input, shape index: {}]   ;;  %s427_s5 = inlined_call_operand.hbm [shape: f32[8,128], index: 5, kind: output, shape index: {}]  }
   0x1   :  { %11 = vsyncpa [#allocation6], 0  ;;  %s28_s20 = sshll.u32 %s423_s1, 4  ;;  %s29_s20 = int_to_ptr.hbm [resolvable:$true] %s28_s20 }
   0x2   :  { %12 = vsyncpa [#allocation4], 0  ;;  %s368_s21 = smov [#allocation5]   ;;  %s18_s25 = sshll.u32 %s422_s0, 4  ;;  %s19_s25 = int_to_ptr.hbm [resolvable:$true] %s18_s25 }
   0x3   :  { %s30_s22 = sshll.u32 %s368_s21, 4  ;;  %s369_s26 = smov 64   ;;  %s31_s22 = int_to_ptr.vmem [resolvable:$true] %s30_s22 }
   0x4   :  { %s370_s27 = smov 4   ;;  %s371_s28 = smov [#allocation2]  }
   0x5   :  { %36 = dma.hbm_to_vmem [thread:$0]  %s29_s20, 256, %s31_s22, [#allocation6], %s369_s26, %s369_s26, %s370_s27  }
   0x6   :  { %s20_s29 = sshll.u32 %s371_s28, 4  ;;  %s43_s7 = sshll.u32 %s425_s3, 4  ;;  %s21_s29 = int_to_ptr.vmem [resolvable:$true] %s20_s29  ;;  %s44_s7 = int_to_ptr.hbm [resolvable:$true] %s43_s7 }
   0x7   :  { %23 = dma.hbm_to_vmem [thread:$0]  %s19_s25, 64, %s21_s29, [#allocation3]  }
   0x8   :  { %s372_s1 = smov [#allocation7]  }
   0x9   :  { %s45_s8 = sshll.u32 %s372_s1, 4  ;;  %s46_s8 = int_to_ptr.vmem [resolvable:$true] %s45_s8 }
   0xa   :  { %51 = dma.hbm_to_vmem [thread:$0]  %s44_s7, 1024, %s46_s8, [#allocation6], %s369_s26, %s369_s26, %s370_s27  }
   0xb   :  { %362 = dma.done.wait [#allocation3], 64  }
   0xc   :  { %363 = vsyncadd [#allocation3], 4294967232 }
   0xd   :  { %364 = dma.done.wait [#allocation6], 1280  }
   0xe   :  { %365 = vsyncadd [#allocation6], 4294966016  ;;  %v249_v0 = vld [vmem:[#allocation5 + $0x8] sm:$0xff]  ;;  %v248_v2 = vld [vmem:[#allocation5] sm:$0xff]  ;;  %vm88_vm0 = vcmask 261120   ;;  %s373_s11 = smov [#allocation8]  }
   0xf   :  { %v257_v1 = vld [vmem:[#allocation7 + $0x38] sm:$0xff]  ;;  %98 = vmatpush.bf16.msra.mxu0 %v249_v0  ;;  %v256_v3 = vld [vmem:[#allocation7 + $0x30] sm:$0xff]  ;;  %v67_v4 = vld [vmem:[#allocation2] sm:$0xf]  ;;  %s194_s12 = sshll.u32 %s373_s11, 4  ;;  %s196_s15 = sshll.u32 %s427_s5, 4  ;;  %s195_s12 = int_to_ptr.vmem [resolvable:$true] %s194_s12  ;;  %s197_s15 = int_to_ptr.hbm [resolvable:$true] %s196_s15 }
  0x10   :  { %175 = vmatpush.bf16.msra.mxu1 %v257_v1  ;;  %v255_v5 = vld [vmem:[#allocation7 + $0x28] sm:$0xff]  ;;  %v254_v6 = vld [vmem:[#allocation7 + $0x20] sm:$0xff]  ;;  %v253_v7 = vld [vmem:[#allocation7 + $0x18] sm:$0xff] }
  0x11   :  { %v252_v8 = vld [vmem:[#allocation7 + $0x10] sm:$0xff]  ;;  %v251_v9 = vld [vmem:[#allocation7 + $0x8] sm:$0xff]  ;;  %v250_v10 = vld [vmem:[#allocation7] sm:$0xff] }
  0x12   :  { %v264_v11 = vld [vmem:[%s424_s2] ss:$0 sm:$0xff] }
  0x13   :  { %99 = vmatpush.bf16.msra.mxu0 %v248_v2  ;;  %v265_v17 = vld [vmem:[%s426_s4] ss:$0 sm:$0xff] }
  0x14   :  { %176 = vmatpush.bf16.msra.mxu1 %v256_v3 }
  0x16   :  { %215 = vmatmul.msk.bf16.vlgmr.msra.gmra.mxu0 %vm88_vm0, %v67_v4 }
  0x18   :  { %177 = vmatpush.bf16.msra.mxu1 %v255_v5 }
  0x1c   :  { %178 = vmatpush.bf16.msra.mxu1 %v254_v6 }
  0x20   :  { %179 = vmatpush.bf16.msra.mxu1 %v253_v7 }
  0x24   :  { %180 = vmatpush.bf16.msra.mxu1 %v252_v8 }
  0x28   :  { %181 = vmatpush.bf16.msra.mxu1 %v251_v9 }
  0x2c   :  { %182 = vmatpush.bf16.msra.mxu1 %v250_v10 }
  0x93   :  { %v101_v12 = vpop.f32.mrf.mxu0 }
  0x94   :  { %v102_v13 = vadd.f32 %v264_v11, %v101_v12 }
  0x96   :  { %v105_v14 = vmax.f32 %v102_v13, 0.0 }
  0x98   :  { %v106_v15 = vpack.c.bf16 %v105_v14, %v105_v14 }
  0x9a   :  { %183 = vmatmul.bf16.vlgmr.msra.gmra.mxu1 %v106_v15 }
  0x9b   :  { %v103_v16 = vpop.f32.mrf.mxu0 }
 0x117   :  { %v184_v18 = vpop.f32.mrf.mxu1 }
 0x118   :  { %v185_v19 = vadd.f32 %v265_v17, %v184_v18 }
 0x11a   :  { %188 = vst [vmem:[#allocation8] sm:$0xff] %v185_v19 }
 0x11b   :  { %199 = dma.vmem_to_hbm [thread:$0]  %s195_s12, 128, %s197_s15, [#allocation4]  }
 0x11f   :  { %v186_v20 = vpop.f32.mrf.mxu1 }
 0x120   :  { %366 = dma.done.wait [#allocation4], 128  }
 0x121   :  { %367 = vsyncadd [#allocation4], 4294967168 }
 0x122   :  { %204 = vsyncpa [#allocation3], 1 }
 0x123   :  { %205 = vsyncpa [#allocation6], 1 }
 0x124   :  { %206 = vsyncpa [#allocation4], 1 }

</bundles_post_ra>
